<compile_context>
chip_gen: v6e
topology: v6e:2x2x1
jax: 0.10.0
libtpu: 0.0.40
codegen_flags: <defaults>
</compile_context>

<pallas_src>
import jax
import jax.numpy as jnp
from jax.experimental import pallas as pl
from jax.experimental.pallas import tpu as pltpu


def _forward_kernel(scalar_ref, x_ref, pos_ref, attn_ref, win_ref, w_ref, out_ref):
    """One stimulus per grid step. Shapes (U = n_units, D = n_dims, C = n_classes):
       scalar_ref: (2,) SMEM [c, phi]     x_ref: (1, D, 1)      pos_ref: (D, U)
       attn_ref:   (D, 1)                 win_ref: (1, 1, U)    w_ref:   (C, U)
       out_ref:    (1, C, 2)  ->  [..., 0] = out, [..., 1] = pr
    """
    c = scalar_ref[0]
    phi = scalar_ref[1]

    x_col = x_ref[0]                                                  # (D, 1)
    win_row = win_ref[0]                                              # (1, U)

    # r == 1 path of _compute_dist: attention-weighted L1 over dims (2-row sublane add).
    # TODO(synk): r > 1 branch of _compute_dist (masked p-norm) not needed for params['r'] == 1.
    dim_dist = jnp.abs(x_col - pos_ref[...])                          # (D, U)
    dist = jnp.sum(attn_ref[...] * dim_dist, axis=0, keepdims=True)   # (1, U)

    act = c * jnp.exp(-c * dist)                                      # (1, U)  _compute_act
    units_out = act * win_row                                         # (1, U)  winning_units mask

    # fc1 (bias-free Linear) + phi scaling: VPU multiply + lane reduce (MXU with N=1 is waste).
    logits = phi * jnp.sum(w_ref[...] * units_out, axis=1, keepdims=True)   # (C, 1)

    # Softmax over the class axis (dim=0 in the PyTorch module).
    m = jnp.max(logits, axis=0, keepdims=True)                        # (1, 1)
    e = jnp.exp(logits - m)                                           # (C, 1)
    pr = e / jnp.sum(e, axis=0, keepdims=True)                        # (C, 1)

    # Pack [out | pr] into the single (C, 2) output block with no transpose / concat.
    col = jax.lax.broadcasted_iota(jnp.int32, (logits.shape[0], 2), 1)
    out_ref[0] = jnp.where(col == 0, logits, pr)                      # (C, 2)


def multi_unit_cluster_forward(x, units_pos, attn, winning_units, fc1_w, params):
    """Batched forward. x: (B, n_dims) or (n_dims,); winning_units: (B, n_units) or (n_units,)."""
    single = x.ndim == 1
    x = jnp.atleast_2d(x).astype(jnp.float32)                         # (B, D)
    batch, n_dims = x.shape
    n_units = units_pos.shape[0]
    n_classes = fc1_w.shape[0]

    winning_units = jnp.asarray(winning_units, jnp.float32)
    if winning_units.ndim == 1:
        winning_units = jnp.broadcast_to(winning_units, (batch, n_units))

    scalars = jnp.array([params["c"], params["phi"]], dtype=jnp.float32)  # runtime, no recompile
    x_cols = x.reshape(batch, n_dims, 1)                               # per-sample (D, 1) column
    pos_t = units_pos.T.astype(jnp.float32)                            # (D, U): units lane-dense
    attn_col = attn.astype(jnp.float32).reshape(n_dims, 1)             # (D, 1)
    win_rows = winning_units.reshape(batch, 1, n_units)                # (B, 1, U)
    w = fc1_w.astype(jnp.float32)                                      # (C, U): units lane-dense

    res = pl.pallas_call(
        _forward_kernel,
        out_shape=jax.ShapeDtypeStruct((batch, n_classes, 2), jnp.float32),
        grid=(batch,),
        in_specs=[
            pl.BlockSpec(memory_space=pltpu.MemorySpace.SMEM),         # [c, phi] scalars
            pl.BlockSpec((1, n_dims, 1), lambda b: (b, 0, 0)),         # x (per sample)
            pl.BlockSpec((n_dims, n_units), lambda b: (0, 0)),         # units_pos^T (resident)
            pl.BlockSpec((n_dims, 1), lambda b: (0, 0)),               # attn (resident)
            pl.BlockSpec((1, 1, n_units), lambda b: (b, 0, 0)),        # winning mask (per sample)
            pl.BlockSpec((n_classes, n_units), lambda b: (0, 0)),      # fc1 weight (resident)
        ],
        out_specs=pl.BlockSpec((1, n_classes, 2), lambda b: (b, 0, 0)),
        compiler_params=pltpu.CompilerParams(
            dimension_semantics=("parallel",),                         # shards batch on v7x's 2 TCs
        ),
    )(scalars, x_cols, pos_t, attn_col, win_rows, w)

    out = res[:, :, 0]
    pr = res[:, :, 1]
    if single:
        return out[0], pr[0]
    return out, pr


def _reference_forward(x, units_pos, attn, winning_units, fc1_w, params):
    """Pure-JAX replica of the PyTorch forward (vectorized over the batch) for checking."""
    dim_dist = jnp.abs(x[:, None, :] - units_pos[None, :, :])          # (B, U, D)
    dist = jnp.sum(attn * dim_dist, axis=-1)                           # (B, U)
    act = params["c"] * jnp.exp(-params["c"] * dist)                   # (B, U)
    units_out = act * winning_units                                    # (B, U)
    out = params["phi"] * (units_out @ fc1_w.T)                        # (B, C)
    pr = jax.nn.softmax(out, axis=-1)
    return out, pr


if __name__ == "__main__":
    # Shapes implied by the module: n_dims = 2 (2-D spatial path), n_classes = 2.
    n_units, n_dims, n_classes, batch = 128, 2, 2, 8
    params = {"r": 1, "c": 2.0, "p": 1, "phi": 1.0,
              "lr_attn": 0.0, "lr_nn": 0.25, "k": 0.05}

    key = jax.random.PRNGKey(0)
    k1, k2, k3, k4 = jax.random.split(key, 4)

    # Deterministic, in-script initialization (shapes per MultiUnitCluster.__init__):
    units_pos = jax.random.uniform(k1, (n_units, n_dims), dtype=jnp.float32)   # torch.rand init
    attn = jnp.ones((n_dims,), jnp.float32) / n_dims                           # dimensional attention
    # fc1.weight / winning_units init to zeros in the module (trivial output); use
    # deterministic non-zero values so the full kernel path is exercised.
    fc1_w = 0.1 * jax.random.normal(k2, (n_classes, n_units), dtype=jnp.float32)
    winning_units = (jax.random.uniform(k3, (batch, n_units)) < params["k"]).astype(jnp.float32)
    x = jax.random.uniform(k4, (batch, n_dims), dtype=jnp.float32)

    out, pr = multi_unit_cluster_forward(x, units_pos, attn, winning_units, fc1_w, params)
    jax.block_until_ready((out, pr))

    ref_out, ref_pr = _reference_forward(x, units_pos, attn, winning_units, fc1_w, params)
    assert out.shape == (batch, n_classes) and pr.shape == (batch, n_classes)
    assert jnp.allclose(out, ref_out, atol=1e-5), (out, ref_out)
    assert jnp.allclose(pr, ref_pr, atol=1e-5), (pr, ref_pr)

    print("KERNEL_OK")
</pallas_src>

<mosaic_0001>
module attributes {stable_mosaic.version = 11 : i64} {
  func.func @_forward_kernel(%arg0: i32, %arg1: memref<2xf32, #tpu.memory_space<smem>>, %arg2: memref<1x2x1xf32, #tpu.memory_space<vmem>>, %arg3: memref<2x128xf32, #tpu.memory_space<vmem>>, %arg4: memref<2x1xf32, #tpu.memory_space<vmem>>, %arg5: memref<1x1x128xf32, #tpu.memory_space<vmem>>, %arg6: memref<2x128xf32, #tpu.memory_space<vmem>>, %arg7: memref<1x2x2xf32, #tpu.memory_space<vmem>>) attributes {dimension_semantics = [#tpu.dimension_semantics<parallel>], iteration_bounds = array<i64: 8>, scalar_prefetch = 0 : i64, scratch_operands = 0 : i64, tpu.core_type = #tpu.core_type<tc>, window_params = [{transform_indices = @transform_0, window_bounds = array<i64: 2>}, {transform_indices = @transform_1, window_bounds = array<i64: 1, 2, 1>}, {pipeline_mode = #tpu.pipeline_mode<synchronous>, transform_indices = @transform_2, window_bounds = array<i64: 2, 128>}, {pipeline_mode = #tpu.pipeline_mode<synchronous>, transform_indices = @transform_3, window_bounds = array<i64: 2, 1>}, {transform_indices = @transform_4, window_bounds = array<i64: 1, 1, 128>}, {pipeline_mode = #tpu.pipeline_mode<synchronous>, transform_indices = @transform_5, window_bounds = array<i64: 2, 128>}, {transform_indices = @transform_6, window_bounds = array<i64: 1, 2, 2>}]} {
    %c0 = arith.constant 0 : index
    %0 = memref.load %arg1[%c0] : memref<2xf32, #tpu.memory_space<smem>>
    %c1 = arith.constant 1 : index
    %1 = memref.load %arg1[%c1] : memref<2xf32, #tpu.memory_space<smem>>
    %c0_0 = arith.constant 0 : index
    %c0_1 = arith.constant 0 : index
    %c0_2 = arith.constant 0 : index
    %2 = vector.load %arg2[%c0_0, %c0_1, %c0_2] : memref<1x2x1xf32, #tpu.memory_space<vmem>>, vector<1x2x1xf32>
    %3 = vector.shape_cast %2 : vector<1x2x1xf32> to vector<2x1xf32>
    %c0_3 = arith.constant 0 : index
    %c0_4 = arith.constant 0 : index
    %c0_5 = arith.constant 0 : index
    %4 = vector.load %arg5[%c0_3, %c0_4, %c0_5] : memref<1x1x128xf32, #tpu.memory_space<vmem>>, vector<1x1x128xf32>
    %5 = vector.shape_cast %4 : vector<1x1x128xf32> to vector<1x128xf32>
    %c0_6 = arith.constant 0 : index
    %c0_7 = arith.constant 0 : index
    %6 = vector.load %arg3[%c0_6, %c0_7] : memref<2x128xf32, #tpu.memory_space<vmem>>, vector<2x128xf32>
    %7 = vector.broadcast %3 : vector<2x1xf32> to vector<2x128xf32>
    %8 = arith.subf %7, %6 : vector<2x128xf32>
    %9 = math.absf %8 : vector<2x128xf32>
    %c0_8 = arith.constant 0 : index
    %c0_9 = arith.constant 0 : index
    %10 = vector.load %arg4[%c0_8, %c0_9] : memref<2x1xf32, #tpu.memory_space<vmem>>, vector<2x1xf32>
    %11 = vector.broadcast %10 : vector<2x1xf32> to vector<2x128xf32>
    %12 = arith.mulf %11, %9 : vector<2x128xf32>
    %cst = arith.constant dense<0.000000e+00> : vector<128xf32>
    %13 = vector.multi_reduction <add>, %12, %cst [0] : vector<2x128xf32> to vector<128xf32>
    %14 = vector.shape_cast %13 : vector<128xf32> to vector<1x128xf32>
    %cst_10 = arith.constant 0.000000e+00 : f32
    %15 = arith.subf %cst_10, %0 : f32
    %16 = vector.broadcast %15 : f32 to vector<1x128xf32>
    %17 = arith.mulf %16, %14 : vector<1x128xf32>
    %18 = math.exp %17 : vector<1x128xf32>
    %19 = vector.broadcast %0 : f32 to vector<1x128xf32>
    %20 = arith.mulf %19, %18 : vector<1x128xf32>
    %21 = arith.mulf %20, %5 : vector<1x128xf32>
    %c0_11 = arith.constant 0 : index
    %c0_12 = arith.constant 0 : index
    %22 = vector.load %arg6[%c0_11, %c0_12] : memref<2x128xf32, #tpu.memory_space<vmem>>, vector<2x128xf32>
    %23 = vector.broadcast %21 : vector<1x128xf32> to vector<2x128xf32>
    %24 = arith.mulf %22, %23 : vector<2x128xf32>
    %cst_13 = arith.constant dense<0.000000e+00> : vector<2xf32>
    %25 = vector.multi_reduction <add>, %24, %cst_13 [1] : vector<2x128xf32> to vector<2xf32>
    %26 = vector.shape_cast %25 : vector<2xf32> to vector<2x1xf32>
    %27 = vector.broadcast %1 : f32 to vector<2x1xf32>
    %28 = arith.mulf %27, %26 : vector<2x1xf32>
    %cst_14 = arith.constant dense<0xFF800000> : vector<1xf32>
    %29 = vector.multi_reduction <maximumf>, %28, %cst_14 [0] : vector<2x1xf32> to vector<1xf32>
    %30 = vector.shape_cast %29 : vector<1xf32> to vector<1x1xf32>
    %31 = vector.broadcast %30 : vector<1x1xf32> to vector<2x1xf32>
    %32 = arith.subf %28, %31 : vector<2x1xf32>
    %33 = math.exp %32 : vector<2x1xf32>
    %cst_15 = arith.constant dense<0.000000e+00> : vector<1xf32>
    %34 = vector.multi_reduction <add>, %33, %cst_15 [0] : vector<2x1xf32> to vector<1xf32>
    %35 = vector.shape_cast %34 : vector<1xf32> to vector<1x1xf32>
    %36 = vector.broadcast %35 : vector<1x1xf32> to vector<2x1xf32>
    %37 = arith.divf %33, %36 : vector<2x1xf32>
    %38 = tpu.iota {dimensions = array<i32: 1>} : vector<2x2xi32>
    %c0_i32 = arith.constant 0 : i32
    %39 = vector.broadcast %c0_i32 : i32 to vector<2x2xi32>
    %40 = arith.cmpi eq, %38, %39 : vector<2x2xi32>
    %41 = vector.shape_cast %28 : vector<2x1xf32> to vector<2x1xf32>
    %42 = vector.broadcast %41 : vector<2x1xf32> to vector<2x2xf32>
    %43 = vector.shape_cast %37 : vector<2x1xf32> to vector<2x1xf32>
    %44 = vector.broadcast %43 : vector<2x1xf32> to vector<2x2xf32>
    %45 = arith.select %40, %42, %44 : vector<2x2xi1>, vector<2x2xf32>
    %c0_16 = arith.constant 0 : index
    %c0_17 = arith.constant 0 : index
    %c0_18 = arith.constant 0 : index
    %46 = vector.load %arg7[%c0_16, %c0_17, %c0_18] : memref<1x2x2xf32, #tpu.memory_space<vmem>>, vector<1x2x2xf32>
    %47 = vector.shape_cast %46 : vector<1x2x2xf32> to vector<2x2xf32>
    %48 = vector.shape_cast %45 : vector<2x2xf32> to vector<1x2x2xf32>
    tpu.vector_store %arg7[%c0_16, %c0_17, %c0_18], %48 {strides = array<i32>} : memref<1x2x2xf32, #tpu.memory_space<vmem>>, vector<1x2x2xf32>,
    return
  }
  func.func @transform_0(%arg0: i32) -> i32 {
    %c0_i32 = arith.constant 0 : i32
    %c0_i32_0 = arith.constant 0 : i32
    return %c0_i32 : i32
  }
  func.func @transform_1(%arg0: i32) -> (i32, i32, i32) {
    %c0_i32 = arith.constant 0 : i32
    %c0_i32_0 = arith.constant 0 : i32
    %c0_i32_1 = arith.constant 0 : i32
    return %arg0, %c0_i32, %c0_i32_0 : i32, i32, i32
  }
  func.func @transform_2(%arg0: i32) -> (i32, i32) {
    %c0_i32 = arith.constant 0 : i32
    %c0_i32_0 = arith.constant 0 : i32
    %c0_i32_1 = arith.constant 0 : i32
    return %c0_i32, %c0_i32_0 : i32, i32
  }
  func.func @transform_3(%arg0: i32) -> (i32, i32) {
    %c0_i32 = arith.constant 0 : i32
    %c0_i32_0 = arith.constant 0 : i32
    %c0_i32_1 = arith.constant 0 : i32
    return %c0_i32, %c0_i32_0 : i32, i32
  }
  func.func @transform_4(%arg0: i32) -> (i32, i32, i32) {
    %c0_i32 = arith.constant 0 : i32
    %c0_i32_0 = arith.constant 0 : i32
    %c0_i32_1 = arith.constant 0 : i32
    return %arg0, %c0_i32, %c0_i32_0 : i32, i32, i32
  }
  func.func @transform_5(%arg0: i32) -> (i32, i32) {
    %c0_i32 = arith.constant 0 : i32
    %c0_i32_0 = arith.constant 0 : i32
    %c0_i32_1 = arith.constant 0 : i32
    return %c0_i32, %c0_i32_0 : i32, i32
  }
  func.func @transform_6(%arg0: i32) -> (i32, i32, i32) {
    %c0_i32 = arith.constant 0 : i32
    %c0_i32_0 = arith.constant 0 : i32
    %c0_i32_1 = arith.constant 0 : i32
    return %arg0, %c0_i32, %c0_i32_0 : i32, i32, i32
  }
}

</mosaic_0001>

<bundles_post_ra>
// kernel: tpu_custom_call.1
= control target key start
LH: loop header
LB: loop body
LE: loop exit
PB: predicated region body
PF: predicated region fallthrough
CT: control target
= control target key end

     0   :  { %11 = vsyncpa [#allocation3], 0  ;;  %s523_s21 = smov 0   ;;  %s578_s0 = inlined_call_operand.vmem [shape: f32[2], index: 0, kind: input, shape index: {}]   ;;  %s579_s1 = inlined_call_operand.vmem [shape: f32[8,2,1], index: 1, kind: input, shape index: {}]   ;;  %s580_s2 = inlined_call_operand.vmem [shape: f32[2,128], index: 2, kind: input, shape index: {}]   ;;  %s581_s3 = inlined_call_operand.vmem [shape: f32[2,1], index: 3, kind: input, shape index: {}]   ;;  %s582_s4 = inlined_call_operand.vmem [shape: f32[8,1,128], index: 4, kind: input, shape index: {}]   ;;  %s583_s5 = inlined_call_operand.vmem [shape: f32[2,128], index: 5, kind: input, shape index: {}]   ;;  %s584_s6 = inlined_call_operand.vmem [shape: f32[8,2,2], index: 6, kind: output, shape index: {}]  }
   0x1 LB: > { %s420_s22 = sadd.s32 4294967295, %s484_s21   ;;  %p422_p0 = scmp.ge.s32.totalorder %s484_s21, 1  ;;  %s484_s21 = sphi %s523_s21, %s17_s21  }
   0x2   : > { %p184_p1 = scmp.lt.s32.totalorder %s484_s21, 9  ;;  %s197_s25 = sshll.u32 %s578_s0, 4  ;;  %s198_s25 = int_to_ptr.vmem [resolvable:$true] %s197_s25 }
   0x3   : > { %p440_p3 = scmp.eq.s32.totalorder %s420_s22, 0  ;;  %s459_s27 = scalar_lea.vmem %s198_s25, 16 }
   0x4   : > { %p534_p2 = pnand %p422_p0, %p184_p1  ;;  %p460_p6 = scmp.ne.s32.totalorder %s198_s25, %s459_s27 }
   0x5   : > { %p467_p10 = scmp.lt.s32.totalorder %s198_s25, %s198_s25  ;;  %p468_p11 = scmp.lt.s32.totalorder %s459_s27, %s459_s27 }
   0x6   : > { %p436_p4 = pneg %p534_p2 }
   0x7   : > { %p469_p12 = por %p468_p11, %p467_p10 }
   0x8   : > { %p437_p5 = pnand %p440_p3, %p436_p4 }
   0xa   : > { %p461_p7 = pneg %p437_p5 }
   0xc   : > { %p462_p8 = pnand %p461_p7, %p460_p6 }
   0xe   : > { %p463_p9 = pneg %p462_p8 }
  0x10   : > { %p470_p13 = pnand %p469_p12, %p463_p9 }
  0x12   : > { %473 = shalt.err (!%p470_p13)
}
  0x13   : > { %s486_s28 = smov [#allocation2]   ;;  %232 = sbr.rel (%p534_p2) target bundleno = 405 (0x195), region = 44 }
  0x14   : > { %439 = dma.vmem_to_smem (!%p437_p5), %s198_s25, 16, %s486_s28, [#allocation3]  }
  0x18   : > { %479 = dma.done.wait (%p440_p3), [#allocation3], 16  }
  0x19   : > { %481 = vsyncadd (%p440_p3), [#allocation3], 4294967280 }
  0x1a   : > { %238 = sfence }
  0x1b   : > { %p264_p0 = scmp.lt.s32.totalorder %s420_s22, 7  ;;  %v487_v0 = vmov 0   ;;  %v287_v2 = vld [vmem:[%s581_s3] sm:$0x3]  ;;  %vm294_vm0 = vcmask 1041408   ;;  %s275_s13 = sld [smem:[#allocation2]]  ;;  %v311_v19 = vlaneseq }
  0x1c   : > { %452 = vset.pattern.permute.xlu0 %v487_v0  ;;  %v279_v3 = vld [vmem:[%s580_s2] sm:$0x3]  ;;  %s429_s20 = sld [smem:[#allocation2 + $0x1]]  ;;  %vm344_vm2 = vcmask 9216  }
  0x1d   : > { %s587_s22 = smov (!%p264_p0, %s420_s22), 7  ;;  %v312_v20 = vshrl.u32 %v311_v19, 7  ;;  %v310_v27 = vld [vmem:[%s583_s5] sm:$0x3]  ;;  %v341_v51 = vand.u32 127, %v311_v19 }
  0x1e   : > { %s427_s29 = sshll.u32 %s587_s22, 1  ;;  %s270_s17 = scalar_lea.vmem %s582_s4, %s587_s22 }
  0x1f   : > { %s267_s8 = scalar_lea.vmem %s579_s1, %s427_s29  ;;  %v278_v23 = vld [vmem:[%s270_s17] sm:$0x1]  ;;  %v313_v25 = vsub.s32 0, %v312_v20  ;;  %vm342_vm1 = vcmp.eq.s32.totalorder %v341_v51, 0  ;;  %s274_s25 = scalar_lea.vmem %s584_s6, %s427_s29 }
  0x20   : > { %v277_v1 = vld [vmem:[%s267_s8] sm:$0x3] }
  0x21   : > { %282 = vperm.xlu0 %452, %v277_v1   ;;  %s302_s14 = ssub.f32 0.0, %s275_s13  ;;  %v307_v21 = vstv %s275_s13 }
  0x22   : > { %v319_v31 = vstv %s429_s20 }
  0x23   : > { %v303_v15 = vstv %s302_s14 }
  0x25   : > { %290 = vperm.xlu0 %452, %v287_v2  }
  0x9c   : > { %v283_v4 = vpop.permute.xlu0 %282 }
  0x9d   : > { %v285_v5 = vsub.f32 %v283_v4, %v279_v3 }
  0x9f   : > { %v286_v6 = vand.u32 2147483647, %v285_v5 }
  0xa0   : > { %v291_v7 = vpop.permute.xlu0 %290 }
  0xa1   : > { %v293_v8 = vmul.f32 %v291_v7, %v286_v6 }
  0xa3   : > { %v295_v9 = vsel %vm294_vm0, %v293_v8, 0.0 }
  0xa4   : > { %v296_v10 = vrot.slane %v295_v9, 4 }
  0xa6   : > { %v297_v11 = vadd.f32 %v296_v10, %v295_v9 }
  0xa8   : > { %v298_v12 = vrot.slane %v297_v11, 2 }
  0xaa   : > { %v299_v13 = vadd.f32 %v298_v12, %v297_v11 }
  0xac   : > { %v300_v14 = vrot.slane %v299_v13, 1 }
  0xae   : > { %v301_v16 = vadd.f32 %v300_v14, %v299_v13 }
  0xb0   : > { %v304_v17 = vmul.f32 %v303_v15, %v301_v16 }
  0xb2   : > { %v305_v18 = vmul.f32 1.442695, %v304_v17 }
  0xb4   : > { %453 = vpow2.f32 %v305_v18 }
  0xc1   : > { %v454_v22 = vpop.eup %453 }
  0xc2   : > { %v308_v24 = vmul.f32 %v454_v22, %v307_v21 }
  0xc4   : > { %v309_v26 = vmul.f32 %v308_v24, %v278_v23 }
  0xc6   : > { %v314_v28 = vrot.slane %v309_v26, %v313_v25 }
  0xc8   : > { %v315_v29 = vmul.f32 %v314_v28, %v310_v27 }
  0xca   : > { %v316_v30 = vsel %vm294_vm0, %v315_v29, 0.0 }
  0xcb   : > { %317 = vadd.xlane.f32.xlu1 %v316_v30 }
 0x154   : > { %v318_v32 = vpop.xlane.xlu1 %317 }
 0x155   : > { %v320_v33 = vmul.f32 %v319_v31, %v318_v32 }
 0x157   : > { %v321_v34 = vsel %vm294_vm0, %v320_v33, -inf }
 0x158   : > { %v322_v35 = vrot.slane %v321_v34, 4 }
 0x15a   : > { %v323_v36 = vmax.f32 %v321_v34, %v322_v35 }
 0x15c   : > { %v324_v37 = vrot.slane %v323_v36, 2 }
 0x15e   : > { %v325_v38 = vmax.f32 %v323_v36, %v324_v37 }
 0x160   : > { %v326_v39 = vrot.slane %v325_v38, 1 }
 0x162   : > { %v327_v40 = vmax.f32 %v325_v38, %v326_v39 }
 0x164   : > { %v328_v41 = vsub.f32 %v320_v33, %v327_v40 }
 0x166   : > { %v329_v42 = vmul.f32 1.442695, %v328_v41 }
 0x168   : > { %455 = vpow2.f32 %v329_v42 }
 0x175   : > { %v456_v43 = vpop.eup %455 }
 0x176   : > { %v331_v44 = vsel %vm294_vm0, %v456_v43, 0.0 }
 0x177   : > { %v332_v45 = vrot.slane %v331_v44, 4 }
 0x179   : > { %v333_v46 = vadd.f32 %v332_v45, %v331_v44 }
 0x17b   : > { %v334_v47 = vrot.slane %v333_v46, 2 }
 0x17d   : > { %v335_v48 = vadd.f32 %v334_v47, %v333_v46 }
 0x17f   : > { %v336_v49 = vrot.slane %v335_v48, 1 }
 0x181   : > { %v337_v50 = vadd.f32 %v336_v49, %v335_v48 }
 0x183   : > { %457 = vrcp.f32 %v337_v50 }
 0x190   : > { %v458_v52 = vpop.eup %457 }
 0x191   : > { %v339_v53 = vmul.f32 %v458_v52, %v456_v43 }
 0x193   : > { %v343_v54 = vsel %vm342_vm1, %v320_v33, %v339_v53 }
 0x194   : > { %345 = vst.msk [vmem:[%s274_s25] sm:$0x3] %vm344_vm2, %v343_v54 }
 0x195 PF: > { %s17_s21 = sadd.s32 1, %s484_s21  }
 0x196   : > { %p14_p1 = scmp.ge.s32.totalorder %s17_s21, 10  }
 0x198   :  { %16 = sbr.rel (!%p14_p1) target bundleno = 1 (0x1), region = 82 }
 0x19d   :  { %365 = vsyncpa [#allocation3], 1 }
 0x19e   :  { %367 = vsyncpa [#allocation3 + $0x1], 1 }

</bundles_post_ra>
